<compile_context>
chip_gen: v6e
topology: v6e:2x2x1
jax: 0.10.0
libtpu: 0.0.40
codegen_flags: <defaults>
</compile_context>

<pallas_src>
import numpy as np
import jax
import jax.numpy as jnp
from jax.experimental import pallas as pl
from jax.experimental.pallas import tpu as pltpu

_EPS = float(np.finfo(float).eps)   # matches np.finfo(float).eps in the torch code
_LANES = 128
_MAX_TILE_ROWS = 4096               # (4096, 128) f32 tile = 2 MiB per input per step


def _num_tc_shards():
    """2 shards only on parts with two TensorCores per device (v7x)."""
    # NOTE: if xprof shows the shard axis is not actually core-sharded on v7x,
    # switch its dimension semantics to pltpu.CORE_PARALLEL.
    try:
        kind = jax.devices()[0].device_kind.lower()
    except Exception:
        return 1
    return 2 if "7" in kind else 1


def _make_gcc_kernel(rows, tile_rows, inner_steps, needs_mask, acc_sublanes):
    """Build the kernel body.

    i_ref, j_ref : VMEM tiles (tile_rows, 128), original dtype (cast in-kernel)
    out_ref      : VMEM (1, 5, 128) per-shard partial sums
                   [sum I, sum J, sum I^2, sum J^2, sum I*J] per lane
    acc_ref      : VMEM scratch (5, acc_sublanes, 128) f32 accumulators
    """

    def reduce_rows(x):
        # (tile_rows, 128) -> (acc_sublanes, 128).  The reshape is
        # (8,128)-tile aligned, so it lowers as a view; the reduce is pure VPU.
        if acc_sublanes == tile_rows:
            return x
        return x.reshape(-1, acc_sublanes, _LANES).sum(axis=0)

    def kernel(i_ref, j_ref, out_ref, acc_ref):
        shard = pl.program_id(0)
        step = pl.program_id(1)

        @pl.when(step == 0)
        def _():
            acc_ref[...] = jnp.zeros_like(acc_ref)

        def accumulate(mask=None):
            i = i_ref[...].astype(jnp.float32)
            j = j_ref[...].astype(jnp.float32)
            if mask is not None:
                i = jnp.where(mask, i, 0.0)
                j = jnp.where(mask, j, 0.0)
            acc_ref[0] += reduce_rows(i)
            acc_ref[1] += reduce_rows(j)
            acc_ref[2] += reduce_rows(i * i)
            acc_ref[3] += reduce_rows(j * j)
            acc_ref[4] += reduce_rows(i * j)

        if needs_mask:
            base = (shard * inner_steps + step) * tile_rows
            is_tail = base + tile_rows > rows   # also true for clamped OOB blocks

            @pl.when(jnp.logical_not(is_tail))
            def _():
                accumulate()                    # fast path: no iota / select

            @pl.when(is_tail)
            def _():
                row_ids = jax.lax.broadcasted_iota(
                    jnp.int32, (tile_rows, _LANES), 0)
                accumulate(mask=(base + row_ids) < rows)
        else:
            accumulate()

        @pl.when(step == pl.num_programs(1) - 1)
        def _():
            # One-time sublane reduction: (5, acc_sublanes, 128) -> (5, 128)
            out_ref[0] = jnp.sum(acc_ref[...], axis=1)

    return kernel


def global_cross_correlation(I, J):
    """JAX/Pallas equivalent of globalCrossCorrelation.forward (returns a scalar)."""
    assert I.shape == J.shape
    n_elems = int(np.prod(I.shape))

    i_flat = jnp.ravel(I)
    j_flat = jnp.ravel(J)

    # Lane-aligned prefix goes through the Pallas kernel; the (<128-element)
    # remainder is summed in the JAX epilogue -- no padded HBM copies.
    rem = n_elems % _LANES
    n_main = n_elems - rem
    rows = n_main // _LANES

    sums = jnp.zeros((5,), jnp.float32)

    if rows > 0:
        if rem:
            i2d = i_flat[:n_main].reshape(rows, _LANES)
            j2d = j_flat[:n_main].reshape(rows, _LANES)
        else:
            # Row-major reshape of a contiguous flat array: no extra HBM pass.
            i2d = i_flat.reshape(rows, _LANES)
            j2d = j_flat.reshape(rows, _LANES)

        tile_rows = rows if rows <= _MAX_TILE_ROWS else _MAX_TILE_ROWS
        num_blocks = -(-rows // tile_rows)
        num_shards = _num_tc_shards() if num_blocks >= 2 else 1
        inner_steps = -(-num_blocks // num_shards)
        needs_mask = (num_shards * inner_steps * tile_rows) != rows

        if num_shards * inner_steps == num_blocks:
            def block_index(shard, step):
                return (shard * inner_steps + step, 0)
        else:
            # Shard rounding leaves a logical block past the end: clamp its DMA
            # to the last real block (its contribution is masked to zero).
            def block_index(shard, step):
                return (jnp.minimum(shard * inner_steps + step, num_blocks - 1), 0)

        # Per-step in-register reduction target: (8, 128) when the tile is
        # sublane-aligned, otherwise (tile_rows, 128) for tiny inputs.
        acc_sublanes = 8 if tile_rows % 8 == 0 else tile_rows

        kernel = _make_gcc_kernel(rows, tile_rows, inner_steps, needs_mask,
                                  acc_sublanes)

        itemsize = int(jnp.dtype(i2d.dtype).itemsize)
        partials = pl.pallas_call(
            kernel,
            out_shape=jax.ShapeDtypeStruct((num_shards, 5, _LANES), jnp.float32),
            grid_spec=pltpu.PrefetchScalarGridSpec(
                num_scalar_prefetch=0,
                grid=(num_shards, inner_steps),
                in_specs=[
                    pl.BlockSpec((tile_rows, _LANES), block_index),
                    pl.BlockSpec((tile_rows, _LANES), block_index),
                ],
                out_specs=pl.BlockSpec((1, 5, _LANES),
                                       lambda shard, step: (shard, 0, 0)),
                scratch_shapes=[pltpu.VMEM((5, acc_sublanes, _LANES), jnp.float32)],
            ),
            compiler_params=pltpu.CompilerParams(
                dimension_semantics=("parallel", "arbitrary"),
                vmem_limit_bytes=32 * 1024 * 1024,
            ),
            cost_estimate=pl.CostEstimate(
                flops=8 * n_main,
                transcendentals=0,
                bytes_accessed=2 * n_main * itemsize + num_shards * 5 * _LANES * 4,
            ),
        )(i2d, j2d)

        # Tiny epilogue: combine per-shard / per-lane partials.
        sums = jnp.sum(partials, axis=(0, 2))  # (5,)

    if rem:
        it = i_flat[n_main:].astype(jnp.float32)
        jt = j_flat[n_main:].astype(jnp.float32)
        sums = sums + jnp.stack([it.sum(), jt.sum(), (it * it).sum(),
                                 (jt * jt).sum(), (it * jt).sum()])

    # Finish the scalar cross-correlation math (negligible vs. the streaming
    # reduction).  Same formulation / eps as the PyTorch reference.
    n = jnp.float32(n_elems)
    i_avg = sums[0] / n
    j_avg = sums[1] / n
    i2_avg = sums[2] / n
    j2_avg = sums[3] / n
    ij_avg = sums[4] / n
    cross = ij_avg - i_avg * j_avg
    i_var = i2_avg - i_avg * i_avg
    j_var = j2_avg - j_avg * j_avg
    cc = cross / (jnp.sqrt(i_var) * jnp.sqrt(j_var) + jnp.float32(_EPS))
    return -1.0 * cc + 1.0


def _reference(I, J):
    I = I.astype(jnp.float32)
    J = J.astype(jnp.float32)
    I_avg, J_avg = jnp.mean(I), jnp.mean(J)
    I2_avg, J2_avg = jnp.mean(I * I), jnp.mean(J * J)
    IJ_avg = jnp.mean(I * J)
    cross = IJ_avg - I_avg * J_avg
    I_var = I2_avg - I_avg ** 2
    J_var = J2_avg - J_avg ** 2
    cc = cross / (jnp.sqrt(I_var) * jnp.sqrt(J_var) + _EPS)
    return -1.0 * cc + 1.0


if __name__ == "__main__":
    key = jax.random.PRNGKey(0)
    k1, k2 = jax.random.split(key)

    # Main case: lane-aligned NCHW input.
    N, C, H, W = 2, 4, 16, 16
    I = jax.random.normal(k1, (N, C, H, W), dtype=jnp.float32)
    # Make J correlated with I so the cc value is non-trivial.
    J = 0.7 * I + 0.3 * jax.random.normal(k2, (N, C, H, W), dtype=jnp.float32)

    loss = jax.block_until_ready(global_cross_correlation(I, J))
    ref = jax.block_until_ready(_reference(I, J))
    assert np.allclose(np.asarray(loss), np.asarray(ref), rtol=1e-5, atol=1e-6), (loss, ref)

    # Secondary case: non-lane-aligned size exercises the JAX remainder path.
    k3, k4 = jax.random.split(k2)
    I2 = jax.random.normal(k3, (1, 3, 10, 10), dtype=jnp.float32)   # 300 elems
    J2 = 0.5 * I2 + 0.5 * jax.random.normal(k4, (1, 3, 10, 10), dtype=jnp.float32)
    loss2 = jax.block_until_ready(global_cross_correlation(I2, J2))
    ref2 = jax.block_until_ready(_reference(I2, J2))
    assert np.allclose(np.asarray(loss2), np.asarray(ref2), rtol=1e-5, atol=1e-6), (loss2, ref2)

    print("KERNEL_OK")
</pallas_src>

<mosaic_0001>
module attributes {stable_mosaic.version = 11 : i64} {
  func.func @kernel(%arg0: i32, %arg1: i32, %arg2: memref<16x128xf32, #tpu.memory_space<vmem>>, %arg3: memref<16x128xf32, #tpu.memory_space<vmem>>, %arg4: memref<1x5x128xf32, #tpu.memory_space<vmem>>, %arg5: memref<5x8x128xf32, #tpu.memory_space<vmem>>) attributes {dimension_semantics = [#tpu.dimension_semantics<parallel>, #tpu.dimension_semantics<arbitrary>], iteration_bounds = array<i64: 1, 1>, scalar_prefetch = 0 : i64, scratch_operands = 1 : i64, tpu.core_type = #tpu.core_type<tc>, window_params = [{transform_indices = @transform_0, window_bounds = array<i64: 16, 128>}, {transform_indices = @transform_1, window_bounds = array<i64: 16, 128>}, {transform_indices = @transform_2, window_bounds = array<i64: 1, 5, 128>}]} {
    %c0_i32 = arith.constant 0 : i32
    %0 = arith.cmpi eq, %arg1, %c0_i32 : i32
    %1 = arith.extui %0 : i1 to i32
    %c0_i32_0 = arith.constant 0 : i32
    %2 = arith.cmpi ne, %1, %c0_i32_0 : i32
    scf.if %2 {
      %cst_36 = arith.constant 0.000000e+00 : f32
      %51 = vector.broadcast %cst_36 : f32 to vector<5x8x128xf32>
      %c0_37 = arith.constant 0 : index
      %c0_38 = arith.constant 0 : index
      %c0_39 = arith.constant 0 : index
      %52 = vector.load %arg5[%c0_37, %c0_38, %c0_39] : memref<5x8x128xf32, #tpu.memory_space<vmem>>, vector<5x8x128xf32>
      tpu.vector_store %arg5[%c0_37, %c0_38, %c0_39], %51 {strides = array<i32>} : memref<5x8x128xf32, #tpu.memory_space<vmem>>, vector<5x8x128xf32>,
    } else {
    }
    %c0 = arith.constant 0 : index
    %c0_1 = arith.constant 0 : index
    %3 = vector.load %arg2[%c0, %c0_1] : memref<16x128xf32, #tpu.memory_space<vmem>>, vector<16x128xf32>
    %c0_2 = arith.constant 0 : index
    %c0_3 = arith.constant 0 : index
    %4 = vector.load %arg3[%c0_2, %c0_3] : memref<16x128xf32, #tpu.memory_space<vmem>>, vector<16x128xf32>
    %c0_4 = arith.constant 0 : index
    %c0_5 = arith.constant 0 : index
    %c0_6 = arith.constant 0 : index
    %5 = vector.load %arg5[%c0_4, %c0_5, %c0_6] : memref<5x8x128xf32, #tpu.memory_space<vmem>>, vector<1x8x128xf32>
    %6 = vector.shape_cast %5 : vector<1x8x128xf32> to vector<8x128xf32>
    %7 = vector.shape_cast %3 : vector<16x128xf32> to vector<2x8x128xf32>
    %cst = arith.constant dense<0.000000e+00> : vector<8x128xf32>
    %8 = vector.multi_reduction <add>, %7, %cst [0] : vector<2x8x128xf32> to vector<8x128xf32>
    %9 = arith.addf %6, %8 : vector<8x128xf32>
    %c0_7 = arith.constant 0 : index
    %c0_8 = arith.constant 0 : index
    %c0_9 = arith.constant 0 : index
    %10 = vector.load %arg5[%c0_7, %c0_8, %c0_9] : memref<5x8x128xf32, #tpu.memory_space<vmem>>, vector<1x8x128xf32>
    %11 = vector.shape_cast %10 : vector<1x8x128xf32> to vector<8x128xf32>
    %12 = vector.shape_cast %9 : vector<8x128xf32> to vector<1x8x128xf32>
    tpu.vector_store %arg5[%c0_7, %c0_8, %c0_9], %12 {strides = array<i32>} : memref<5x8x128xf32, #tpu.memory_space<vmem>>, vector<1x8x128xf32>,
    %c1 = arith.constant 1 : index
    %c0_10 = arith.constant 0 : index
    %c0_11 = arith.constant 0 : index
    %13 = vector.load %arg5[%c1, %c0_10, %c0_11] : memref<5x8x128xf32, #tpu.memory_space<vmem>>, vector<1x8x128xf32>
    %14 = vector.shape_cast %13 : vector<1x8x128xf32> to vector<8x128xf32>
    %15 = vector.shape_cast %4 : vector<16x128xf32> to vector<2x8x128xf32>
    %cst_12 = arith.constant dense<0.000000e+00> : vector<8x128xf32>
    %16 = vector.multi_reduction <add>, %15, %cst_12 [0] : vector<2x8x128xf32> to vector<8x128xf32>
    %17 = arith.addf %14, %16 : vector<8x128xf32>
    %c1_13 = arith.constant 1 : index
    %c0_14 = arith.constant 0 : index
    %c0_15 = arith.constant 0 : index
    %18 = vector.load %arg5[%c1_13, %c0_14, %c0_15] : memref<5x8x128xf32, #tpu.memory_space<vmem>>, vector<1x8x128xf32>
    %19 = vector.shape_cast %18 : vector<1x8x128xf32> to vector<8x128xf32>
    %20 = vector.shape_cast %17 : vector<8x128xf32> to vector<1x8x128xf32>
    tpu.vector_store %arg5[%c1_13, %c0_14, %c0_15], %20 {strides = array<i32>} : memref<5x8x128xf32, #tpu.memory_space<vmem>>, vector<1x8x128xf32>,
    %c2 = arith.constant 2 : index
    %c0_16 = arith.constant 0 : index
    %c0_17 = arith.constant 0 : index
    %21 = vector.load %arg5[%c2, %c0_16, %c0_17] : memref<5x8x128xf32, #tpu.memory_space<vmem>>, vector<1x8x128xf32>
    %22 = vector.shape_cast %21 : vector<1x8x128xf32> to vector<8x128xf32>
    %23 = arith.mulf %3, %3 : vector<16x128xf32>
    %24 = vector.shape_cast %23 : vector<16x128xf32> to vector<2x8x128xf32>
    %cst_18 = arith.constant dense<0.000000e+00> : vector<8x128xf32>
    %25 = vector.multi_reduction <add>, %24, %cst_18 [0] : vector<2x8x128xf32> to vector<8x128xf32>
    %26 = arith.addf %22, %25 : vector<8x128xf32>
    %c2_19 = arith.constant 2 : index
    %c0_20 = arith.constant 0 : index
    %c0_21 = arith.constant 0 : index
    %27 = vector.load %arg5[%c2_19, %c0_20, %c0_21] : memref<5x8x128xf32, #tpu.memory_space<vmem>>, vector<1x8x128xf32>
    %28 = vector.shape_cast %27 : vector<1x8x128xf32> to vector<8x128xf32>
    %29 = vector.shape_cast %26 : vector<8x128xf32> to vector<1x8x128xf32>
    tpu.vector_store %arg5[%c2_19, %c0_20, %c0_21], %29 {strides = array<i32>} : memref<5x8x128xf32, #tpu.memory_space<vmem>>, vector<1x8x128xf32>,
    %c3 = arith.constant 3 : index
    %c0_22 = arith.constant 0 : index
    %c0_23 = arith.constant 0 : index
    %30 = vector.load %arg5[%c3, %c0_22, %c0_23] : memref<5x8x128xf32, #tpu.memory_space<vmem>>, vector<1x8x128xf32>
    %31 = vector.shape_cast %30 : vector<1x8x128xf32> to vector<8x128xf32>
    %32 = arith.mulf %4, %4 : vector<16x128xf32>
    %33 = vector.shape_cast %32 : vector<16x128xf32> to vector<2x8x128xf32>
    %cst_24 = arith.constant dense<0.000000e+00> : vector<8x128xf32>
    %34 = vector.multi_reduction <add>, %33, %cst_24 [0] : vector<2x8x128xf32> to vector<8x128xf32>
    %35 = arith.addf %31, %34 : vector<8x128xf32>
    %c3_25 = arith.constant 3 : index
    %c0_26 = arith.constant 0 : index
    %c0_27 = arith.constant 0 : index
    %36 = vector.load %arg5[%c3_25, %c0_26, %c0_27] : memref<5x8x128xf32, #tpu.memory_space<vmem>>, vector<1x8x128xf32>
    %37 = vector.shape_cast %36 : vector<1x8x128xf32> to vector<8x128xf32>
    %38 = vector.shape_cast %35 : vector<8x128xf32> to vector<1x8x128xf32>
    tpu.vector_store %arg5[%c3_25, %c0_26, %c0_27], %38 {strides = array<i32>} : memref<5x8x128xf32, #tpu.memory_space<vmem>>, vector<1x8x128xf32>,
    %c4 = arith.constant 4 : index
    %c0_28 = arith.constant 0 : index
    %c0_29 = arith.constant 0 : index
    %39 = vector.load %arg5[%c4, %c0_28, %c0_29] : memref<5x8x128xf32, #tpu.memory_space<vmem>>, vector<1x8x128xf32>
    %40 = vector.shape_cast %39 : vector<1x8x128xf32> to vector<8x128xf32>
    %41 = arith.mulf %3, %4 : vector<16x128xf32>
    %42 = vector.shape_cast %41 : vector<16x128xf32> to vector<2x8x128xf32>
    %cst_30 = arith.constant dense<0.000000e+00> : vector<8x128xf32>
    %43 = vector.multi_reduction <add>, %42, %cst_30 [0] : vector<2x8x128xf32> to vector<8x128xf32>
    %44 = arith.addf %40, %43 : vector<8x128xf32>
    %c4_31 = arith.constant 4 : index
    %c0_32 = arith.constant 0 : index
    %c0_33 = arith.constant 0 : index
    %45 = vector.load %arg5[%c4_31, %c0_32, %c0_33] : memref<5x8x128xf32, #tpu.memory_space<vmem>>, vector<1x8x128xf32>
    %46 = vector.shape_cast %45 : vector<1x8x128xf32> to vector<8x128xf32>
    %47 = vector.shape_cast %44 : vector<8x128xf32> to vector<1x8x128xf32>
    tpu.vector_store %arg5[%c4_31, %c0_32, %c0_33], %47 {strides = array<i32>} : memref<5x8x128xf32, #tpu.memory_space<vmem>>, vector<1x8x128xf32>,
    %c0_i32_34 = arith.constant 0 : i32
    %48 = arith.cmpi eq, %arg1, %c0_i32_34 : i32
    %49 = arith.extui %48 : i1 to i32
    %c0_i32_35 = arith.constant 0 : i32
    %50 = arith.cmpi ne, %49, %c0_i32_35 : i32
    scf.if %50 {
      %c0_36 = arith.constant 0 : index
      %c0_37 = arith.constant 0 : index
      %c0_38 = arith.constant 0 : index
      %51 = vector.load %arg5[%c0_36, %c0_37, %c0_38] : memref<5x8x128xf32, #tpu.memory_space<vmem>>, vector<5x8x128xf32>
      %cst_39 = arith.constant dense<0.000000e+00> : vector<5x128xf32>
      %52 = vector.multi_reduction <add>, %51, %cst_39 [1] : vector<5x8x128xf32> to vector<5x128xf32>
      %c0_40 = arith.constant 0 : index
      %c0_41 = arith.constant 0 : index
      %c0_42 = arith.constant 0 : index
      %53 = vector.load %arg4[%c0_40, %c0_41, %c0_42] : memref<1x5x128xf32, #tpu.memory_space<vmem>>, vector<1x5x128xf32>
      %54 = vector.shape_cast %53 : vector<1x5x128xf32> to vector<5x128xf32>
      %55 = vector.shape_cast %52 : vector<5x128xf32> to vector<1x5x128xf32>
      tpu.vector_store %arg4[%c0_40, %c0_41, %c0_42], %55 {strides = array<i32>} : memref<1x5x128xf32, #tpu.memory_space<vmem>>, vector<1x5x128xf32>,
    } else {
    }
    return
  }
  func.func @transform_0(%arg0: i32, %arg1: i32) -> (i32, i32) {
    %c1_i32 = arith.constant 1 : i32
    %0 = arith.muli %arg0, %c1_i32 : i32
    %1 = arith.addi %0, %arg1 : i32
    %c0_i32 = arith.constant 0 : i32
    %c0_i32_0 = arith.constant 0 : i32
    return %1, %c0_i32 : i32, i32
  }
  func.func @transform_1(%arg0: i32, %arg1: i32) -> (i32, i32) {
    %c1_i32 = arith.constant 1 : i32
    %0 = arith.muli %arg0, %c1_i32 : i32
    %1 = arith.addi %0, %arg1 : i32
    %c0_i32 = arith.constant 0 : i32
    %c0_i32_0 = arith.constant 0 : i32
    return %1, %c0_i32 : i32, i32
  }
  func.func @transform_2(%arg0: i32, %arg1: i32) -> (i32, i32, i32) {
    %c0_i32 = arith.constant 0 : i32
    %c0_i32_0 = arith.constant 0 : i32
    %c0_i32_1 = arith.constant 0 : i32
    return %arg0, %c0_i32, %c0_i32_0 : i32, i32, i32
  }
}

</mosaic_0001>

<bundles_post_ra>
// kernel: tpu_custom_call.1
= control target key start
LH: loop header
LB: loop body
LE: loop exit
PB: predicated region body
PF: predicated region fallthrough
CT: control target
= control target key end

     0   :  { %7 = vsyncpa [#allocation4], 0  ;;  %s229_s0 = inlined_call_operand.hbm [shape: f32[16,128], index: 0, kind: input, shape index: {}]   ;;  %s230_s1 = inlined_call_operand.hbm [shape: f32[16,128], index: 1, kind: input, shape index: {}]   ;;  %s231_s2 = inlined_call_operand.vmem [shape: f32[1,5,128], index: 2, kind: output, shape index: {}]  }
   0x1   :  { %8 = vsyncpa [#allocation6], 0  ;;  %s201_s9 = smov [#allocation3]  }
   0x2   :  { %s18_s10 = sshll.u32 %s201_s9, 4  ;;  %s19_s10 = int_to_ptr.vmem [resolvable:$true] %s18_s10 }
   0x3   :  { %s165_s11 = scalar_lea.vmem %s19_s10, 256  ;;  %p170_p1 = scmp.lt.s32.totalorder %s19_s10, %s19_s10 }
   0x4   :  { %p166_p0 = scmp.ne.s32.totalorder %s19_s10, %s165_s11  ;;  %p171_p2 = scmp.lt.s32.totalorder %s165_s11, %s165_s11 }
   0x6   :  { %p172_p3 = por %p171_p2, %p170_p1 }
   0x8   :  { %p173_p4 = pnand %p172_p3, %p166_p0 }
   0xa   :  { %176 = shalt.err (!%p173_p4)
}
   0xb   :  { %s202_s12 = smov 128   ;;  %s203_s13 = smov 8  }
   0xc   :  { %24 = dma.hbm_to_vmem [thread:$0]  %s229_s0, 256, %s19_s10, [#allocation4], %s202_s12, %s202_s12, %s203_s13  }
   0xd   :  { %s204_s16 = smov [#allocation5]  }
   0xe   :  { %s34_s17 = sshll.u32 %s204_s16, 4  ;;  %s35_s17 = int_to_ptr.vmem [resolvable:$true] %s34_s17 }
   0xf   :  { %s185_s18 = scalar_lea.vmem %s35_s17, 256  ;;  %p190_p6 = scmp.lt.s32.totalorder %s35_s17, %s35_s17 }
  0x10   :  { %p186_p5 = scmp.ne.s32.totalorder %s35_s17, %s185_s18  ;;  %p191_p7 = scmp.lt.s32.totalorder %s185_s18, %s185_s18 }
  0x12   :  { %p192_p8 = por %p191_p7, %p190_p6 }
  0x14   :  { %p193_p9 = pnand %p192_p8, %p186_p5 }
  0x16   :  { %196 = shalt.err (!%p193_p9)
}
  0x17   :  { %40 = dma.hbm_to_vmem [thread:$0]  %s230_s1, 256, %s35_s17, [#allocation6], %s202_s12, %s202_s12, %s203_s13  }
  0x18   :  { %197 = dma.done.wait [#allocation4], 256  }
  0x19   :  { %198 = vsyncadd [#allocation4], 4294967040 }
  0x1a   :  { %199 = dma.done.wait [#allocation6], 256  }
  0x1b   :  { %200 = vsyncadd [#allocation6], 4294967040  ;;  %v60_v0 = vld [vmem:[#allocation3] sm:$0xff]  ;;  %v61_v1 = vld [vmem:[#allocation3 + $0x8] sm:$0xff]  ;;  %vm137_vm0 = vcmask 1041409   ;;  %vm139_vm1 = vcmask 1042434  }
  0x1c   :  { %v62_v2 = vld [vmem:[#allocation5] sm:$0xff]  ;;  %v63_v3 = vld [vmem:[#allocation5 + $0x8] sm:$0xff]  ;;  %v65_v4 = vadd.f32 %v61_v1, %v60_v0  ;;  %v75_v5 = vmul.f32 %v60_v0, %v60_v0  ;;  %v76_v6 = vmul.f32 %v61_v1, %v61_v1  ;;  %vm141_vm2 = vcmask 1043459  }
  0x1d   :  { %v82_v7 = vmul.f32 %v62_v2, %v62_v2  ;;  %v70_v8 = vadd.f32 %v63_v3, %v62_v2  ;;  %v83_v9 = vmul.f32 %v63_v3, %v63_v3  ;;  %v89_v10 = vmul.f32 %v62_v2, %v60_v0 }
  0x1e   :  { %v90_v11 = vmul.f32 %v63_v3, %v61_v1  ;;  %v77_v12 = vadd.f32 %v76_v6, %v75_v5  ;;  %v102_v13 = vrot.slane %v65_v4, 4  ;;  %vm143_vm3 = vcmask 1044484  }
  0x1f   :  { %v84_v14 = vadd.f32 %v83_v9, %v82_v7  ;;  %v108_v16 = vrot.slane %v70_v8, 4 }
  0x20   :  { %v91_v15 = vadd.f32 %v90_v11, %v89_v10  ;;  %v103_v17 = vadd.f32 %v102_v13, %v65_v4  ;;  %v114_v18 = vrot.slane %v77_v12, 4 }
  0x21   :  { %v109_v19 = vadd.f32 %v108_v16, %v70_v8  ;;  %v120_v20 = vrot.slane %v84_v14, 4 }
  0x22   :  { %v126_v21 = vrot.slane %v91_v15, 4  ;;  %v104_v22 = vrot.slane %v103_v17, 2  ;;  %v115_v23 = vadd.f32 %v114_v18, %v77_v12 }
  0x23   :  { %v110_v24 = vrot.slane %v109_v19, 2  ;;  %v121_v25 = vadd.f32 %v120_v20, %v84_v14 }
  0x24   :  { %v127_v26 = vadd.f32 %v126_v21, %v91_v15  ;;  %v105_v27 = vadd.f32 %v104_v22, %v103_v17  ;;  %v116_v28 = vrot.slane %v115_v23, 2 }
  0x25   :  { %v111_v29 = vadd.f32 %v110_v24, %v109_v19  ;;  %v122_v30 = vrot.slane %v121_v25, 2 }
  0x26   :  { %v128_v31 = vrot.slane %v127_v26, 2  ;;  %v106_v32 = vrot.slane %v105_v27, 1  ;;  %v117_v33 = vadd.f32 %v116_v28, %v115_v23 }
  0x27   :  { %v112_v34 = vrot.slane %v111_v29, 1  ;;  %v123_v35 = vadd.f32 %v122_v30, %v121_v25 }
  0x28   :  { %v129_v36 = vadd.f32 %v128_v31, %v127_v26  ;;  %v107_v37 = vadd.f32 %v106_v32, %v105_v27  ;;  %v118_v38 = vrot.slane %v117_v33, 1 }
  0x29   :  { %v113_v39 = vadd.f32 %v112_v34, %v111_v29  ;;  %v124_v40 = vrot.slane %v123_v35, 1 }
  0x2a   :  { %v130_v41 = vrot.slane %v129_v36, 1  ;;  %v119_v42 = vadd.f32 %v118_v38, %v117_v33 }
  0x2b   :  { %v125_v43 = vadd.f32 %v124_v40, %v123_v35  ;;  %v138_v45 = vsel %vm137_vm0, %v113_v39, %v107_v37 }
  0x2c   :  { %v131_v44 = vadd.f32 %v130_v41, %v129_v36  ;;  %v140_v46 = vsel %vm139_vm1, %v119_v42, %v138_v45 }
  0x2d   :  { %v142_v47 = vsel %vm141_vm2, %v125_v43, %v140_v46 }
  0x2e   :  { %v144_v48 = vsel %vm143_vm3, %v131_v44, %v142_v47 }
  0x2f   :  { %146 = vst [vmem:[%s231_s2] sm:$0x1f] %v144_v48 }
  0x30   :  { %151 = vsyncpa [#allocation4], 1 }
  0x31   :  { %152 = vsyncpa [#allocation6], 1 }

</bundles_post_ra>
